<compile_context>
chip_gen: v7x
topology: tpu7x:2x2x1
jax: 0.10.0
libtpu: 0.0.40
codegen_flags: <defaults>
</compile_context>

<pallas_src>
import jax
import jax.numpy as jnp
from jax.experimental import pallas as pl
from jax.experimental.pallas import tpu as pltpu


# ImageNet normalization constants (per channel, RGB).
IMAGENET_MEAN = (0.485, 0.456, 0.406)
IMAGENET_STD = (0.229, 0.224, 0.225)


def _round_up(x, m):
    return ((x + m - 1) // m) * m


def _vmem_capacity_bytes():
    try:
        return int(pltpu.get_tpu_info().vmem_capacity_bytes)
    except Exception:
        return 64 * 1024 * 1024  # conservative: v7x per-TC VMEM


def _vmem_tile_use_bytes(tm, tk, tn):
    """Estimate compiler-scoped VMEM for one grid step (double-buffered)."""
    lane = 128
    tn_v = _round_up(tn, lane)
    x_tile = _round_up(tm, 8) * _round_up(tk, lane) * 4     # f32 x tile
    w_tile = _round_up(tk, 16) * tn_v * 2                   # bf16 W tile
    b_tile = 8 * tn_v * 4                                   # f32 bias row
    o_tile = _round_up(tm, 8) * tn_v * 4                    # f32 output tile
    return 2 * (x_tile + w_tile + b_tile) + 2 * o_tile


def _pick_tk(dp, tm, tn, budget, force_tk=None):
    """Largest multiple of 128 that divides dp and fits the VMEM budget."""
    if force_tk is not None:
        assert force_tk % 128 == 0 and dp % force_tk == 0
        return force_tk
    best = 128
    cand = 128
    while cand <= dp:
        if dp % cand == 0 and _vmem_tile_use_bytes(tm, cand, tn) <= budget:
            best = cand
        cand += 128
    return best


def _pick_tn(k):
    """Output-column tile.  Small heads: full-extent (no HBM K padding)."""
    if k <= 512:
        return k, k                       # tn, kp  (no padding at all)
    for tn in (512, 256, 128):
        if k % tn == 0:
            return tn, k
    return 128, _round_up(k, 128)         # rare: pad K to next 128 only


def _linear_kernel_noreduce(x_ref, w_ref, b_ref, o_ref):
    """Whole reduction in one tile:  o = x @ W' + b'  (single invocation)."""
    o_ref[...] = (
        jnp.dot(x_ref[...].astype(w_ref.dtype), w_ref[...],
                preferred_element_type=jnp.float32)
        + b_ref[...]
    )


def _linear_kernel_reduce(x_ref, w_ref, b_ref, o_ref):
    """Grid axis 2 walks the D (reduction) axis; accumulate into o_ref.

    o_ref's block index is constant across axis 2, so it stays VMEM-resident;
    it is initialized with the broadcast bias at r==0 (no scratch accumulator,
    no finalize copy).
    """
    @pl.when(pl.program_id(2) == 0)
    def _init():
        o_ref[...] = jnp.broadcast_to(b_ref[...], o_ref.shape)

    o_ref[...] += jnp.dot(x_ref[...].astype(w_ref.dtype), w_ref[...],
                          preferred_element_type=jnp.float32)


def make_uar_forward(weight, bias, image_shape, matmul_dtype=jnp.bfloat16,
                     force_tk=None):
    """Build the forward fn of the attacked model: denorm + flatten + Linear.

    weight: [D, K] f32, bias: [K] f32, image_shape = (C, H, W), D == C*H*W.
    All constant folding / padding is done once here (hoisted out of the
    per-call path); the returned closure runs a single pure-matmul kernel.
    `force_tk` exists only to exercise the reduction-tiled path in tests.
    """
    c, h, w = image_shape
    d, k = weight.shape
    assert d == c * h * w
    assert c == len(IMAGENET_MEAN), "InverseImagenetTransform expects 3 RGB channels"

    # ---- one-time constant folding: (x*std + mean) @ W + b == x @ W' + b' ----
    std_vec = jnp.repeat(jnp.asarray(IMAGENET_STD, jnp.float32), h * w)    # (D,)
    mean_vec = jnp.repeat(jnp.asarray(IMAGENET_MEAN, jnp.float32), h * w)  # (D,)
    w_f32 = weight.astype(jnp.float32)
    w_folded = std_vec[:, None] * w_f32                                    # (D, K)
    b_folded = mean_vec @ w_f32 + bias.astype(jnp.float32)                 # (K,)

    # ---- one-time shape prep (no 128-padding of K in HBM) ----
    tn, kp = _pick_tn(k)
    dp = _round_up(d, 128)                 # only needed if D itself is ragged

    w_pad = w_folded
    if (dp, kp) != (d, k):
        w_pad = jnp.zeros((dp, kp), jnp.float32).at[:d, :k].set(w_folded)
    w_pad = w_pad.astype(matmul_dtype)     # bf16 MXU operand in HBM
    b_pad = jnp.zeros((1, kp), jnp.float32).at[0, :k].set(b_folded)

    vmem_cap = _vmem_capacity_bytes()
    vmem_budget = int(vmem_cap * 0.6)      # tiles sized against this
    vmem_limit = min(int(vmem_cap * 0.75), 100 * 1024 * 1024)

    def forward(x_nchw):
        n = x_nchw.shape[0]

        # sublane-dense bf16 rows: pad batch to a multiple of 16
        if n <= 256:
            tm = _round_up(n, 16)
            np_ = tm
        else:
            tm = 256
            np_ = _round_up(n, tm)

        # x stays f32; cast to bf16 per-tile inside the kernel.
        x2 = x_nchw.reshape(n, d).astype(jnp.float32)
        if dp != d:
            x2 = jnp.pad(x2, ((0, 0), (0, dp - d)))
        if np_ != n:
            x2 = jnp.pad(x2, ((0, np_ - n), (0, 0)))

        tk = _pick_tk(dp, tm, tn, vmem_budget, force_tk)
        r_steps = dp // tk

        flops = 2 * np_ * dp * kp
        bytes_accessed = (np_ * dp * 4) * (kp // tn) \
            + (dp * kp * w_pad.dtype.itemsize) * (np_ // tm) \
            + np_ * kp * 4
        cost = pl.CostEstimate(flops=flops, transcendentals=0,
                               bytes_accessed=bytes_accessed)

        if r_steps == 1:
            # Whole reduction fits: no reduction axis, no accumulator.
            grid = (np_ // tm, kp // tn)
            out = pl.pallas_call(
                _linear_kernel_noreduce,
                out_shape=jax.ShapeDtypeStruct((np_, kp), jnp.float32),
                grid_spec=pltpu.PrefetchScalarGridSpec(
                    num_scalar_prefetch=0,
                    grid=grid,
                    in_specs=[
                        pl.BlockSpec((tm, dp), lambda i, j: (i, 0)),
                        pl.BlockSpec((dp, tn), lambda i, j: (0, j)),
                        pl.BlockSpec((1, tn), lambda i, j: (0, j)),
                    ],
                    out_specs=pl.BlockSpec((tm, tn), lambda i, j: (i, j)),
                ),
                compiler_params=pltpu.CompilerParams(
                    dimension_semantics=("parallel", "parallel"),
                    vmem_limit_bytes=vmem_limit,
                ),
                cost_estimate=cost,
            )(x2, w_pad, b_pad)
        else:
            # Large D: stream W in big tk x tn tiles, reduction axis last,
            # accumulate directly into the VMEM-resident output block.
            grid = (np_ // tm, kp // tn, r_steps)
            out = pl.pallas_call(
                _linear_kernel_reduce,
                out_shape=jax.ShapeDtypeStruct((np_, kp), jnp.float32),
                grid_spec=pltpu.PrefetchScalarGridSpec(
                    num_scalar_prefetch=0,
                    grid=grid,
                    in_specs=[
                        pl.BlockSpec((tm, tk), lambda i, j, r: (i, r)),
                        pl.BlockSpec((tk, tn), lambda i, j, r: (r, j)),
                        pl.BlockSpec((1, tn), lambda i, j, r: (0, j)),
                    ],
                    out_specs=pl.BlockSpec((tm, tn), lambda i, j, r: (i, j)),
                ),
                compiler_params=pltpu.CompilerParams(
                    dimension_semantics=("parallel", "parallel", "arbitrary"),
                    vmem_limit_bytes=vmem_limit,
                ),
                cost_estimate=cost,
            )(x2, w_pad, b_pad)

        return out[:n, :k]

    return jax.jit(forward)


def _reference_f32(x_nchw, weight, bias):
    """Exact f32 semantics of the original module's model forward."""
    std = jnp.asarray(IMAGENET_STD, jnp.float32).reshape(1, 3, 1, 1)
    mean = jnp.asarray(IMAGENET_MEAN, jnp.float32).reshape(1, 3, 1, 1)
    inv = (x_nchw * std + mean) * 255.0      # InverseImagenetTransform
    pix = inv / 255.0                        # / 255
    flat = pix.reshape(x_nchw.shape[0], -1)  # synthetic model: flatten + linear
    return flat @ weight + bias


def _reference_matched(x_nchw, weight, bias, matmul_dtype):
    """Reference that mirrors the kernel's folding + bf16 MXU dtype exactly."""
    _, _, h, w = x_nchw.shape
    std_vec = jnp.repeat(jnp.asarray(IMAGENET_STD, jnp.float32), h * w)
    mean_vec = jnp.repeat(jnp.asarray(IMAGENET_MEAN, jnp.float32), h * w)
    w_folded = std_vec[:, None] * weight
    b_folded = mean_vec @ weight + bias
    x_flat = x_nchw.reshape(x_nchw.shape[0], -1)
    acc = jnp.dot(
        x_flat.astype(matmul_dtype),
        w_folded.astype(matmul_dtype),
        preferred_element_type=jnp.float32,
    )
    return acc + b_folded


if __name__ == "__main__":
    key = jax.random.PRNGKey(0)
    k_x, k_w, k_b = jax.random.split(key, 3)

    # Small shapes consistent with the module: NCHW image batch + linear head.
    N, C, H, W = 2, 3, 16, 16
    K = 8
    D = C * H * W

    x = jax.random.normal(k_x, (N, C, H, W), dtype=jnp.float32)
    weight = jax.random.normal(k_w, (D, K), dtype=jnp.float32) * 0.02
    bias = jax.random.normal(k_b, (K,), dtype=jnp.float32) * 0.1

    y_strict = _reference_matched(x, weight, bias, jnp.bfloat16)
    y_f32 = _reference_f32(x, weight, bias)

    # Path 1: whole reduction fits in VMEM -> single-invocation matmul kernel.
    forward = make_uar_forward(weight, bias, (C, H, W))
    y = jax.block_until_ready(forward(x))
    assert y.shape == (N, K)
    assert jnp.allclose(y, y_strict, atol=1e-4, rtol=1e-4), "mismatch vs matched ref"
    assert jnp.allclose(y, y_f32, atol=5e-2, rtol=5e-2), "mismatch vs f32 semantics"

    # Path 2: force a reduction-tiled grid (as used for realistic D ~ 150k).
    forward_red = make_uar_forward(weight, bias, (C, H, W), force_tk=256)
    y2 = jax.block_until_ready(forward_red(x))
    assert y2.shape == (N, K)
    assert jnp.allclose(y2, y_strict, atol=1e-4, rtol=1e-4), "reduce path mismatch"
    assert jnp.allclose(y2, y_f32, atol=5e-2, rtol=5e-2), "reduce path f32 mismatch"

    print("KERNEL_OK")
</pallas_src>

<mosaic_0001>
module attributes {stable_mosaic.version = 11 : i64} {
  func.func @_linear_kernel_noreduce(%arg0: i32, %arg1: i32, %arg2: memref<16x768xf32, #tpu.memory_space<vmem>>, %arg3: memref<768x8xbf16, #tpu.memory_space<vmem>>, %arg4: memref<1x8xf32, #tpu.memory_space<vmem>>, %arg5: memref<16x8xf32, #tpu.memory_space<vmem>>) attributes {dimension_semantics = [#tpu.dimension_semantics<parallel>, #tpu.dimension_semantics<parallel>], iteration_bounds = array<i64: 1, 1>, scalar_prefetch = 0 : i64, scratch_operands = 0 : i64, tpu.core_type = #tpu.core_type<tc>, window_params = [{transform_indices = @transform_0, window_bounds = array<i64: 16, 768>}, {transform_indices = @transform_1, window_bounds = array<i64: 768, 8>}, {transform_indices = @transform_2, window_bounds = array<i64: 1, 8>}, {transform_indices = @transform_3, window_bounds = array<i64: 16, 8>}]} {
    %c0 = arith.constant 0 : index
    %c0_0 = arith.constant 0 : index
    %0 = vector.load %arg2[%c0, %c0_0] : memref<16x768xf32, #tpu.memory_space<vmem>>, vector<16x768xf32>
    %1 = arith.truncf %0 : vector<16x768xf32> to vector<16x768xbf16>
    %c0_1 = arith.constant 0 : index
    %c0_2 = arith.constant 0 : index
    %2 = vector.load %arg3[%c0_1, %c0_2] : memref<768x8xbf16, #tpu.memory_space<vmem>>, vector<768x8xbf16>
    %cst = arith.constant dense<0.000000e+00> : vector<16x8xf32>
    %3 = tpu.matmul %1, %2, %cst {dimension_numbers = #tpu.dot_dimension_numbers<[1], [0], [0], [1], [0, 0, 1, 1], [], []>} : vector<16x768xbf16>, vector<768x8xbf16>, vector<16x8xf32> -> vector<16x8xf32>
    %c0_3 = arith.constant 0 : index
    %c0_4 = arith.constant 0 : index
    %4 = vector.load %arg4[%c0_3, %c0_4] : memref<1x8xf32, #tpu.memory_space<vmem>>, vector<1x8xf32>
    %5 = vector.broadcast %4 : vector<1x8xf32> to vector<16x8xf32>
    %6 = arith.addf %3, %5 : vector<16x8xf32>
    %c0_5 = arith.constant 0 : index
    %c0_6 = arith.constant 0 : index
    %7 = vector.load %arg5[%c0_5, %c0_6] : memref<16x8xf32, #tpu.memory_space<vmem>>, vector<16x8xf32>
    tpu.vector_store %arg5[%c0_5, %c0_6], %6 {strides = array<i32>} : memref<16x8xf32, #tpu.memory_space<vmem>>, vector<16x8xf32>,
    return
  }
  func.func @transform_0(%arg0: i32, %arg1: i32) -> (i32, i32) {
    %c0_i32 = arith.constant 0 : i32
    %c0_i32_0 = arith.constant 0 : i32
    return %arg0, %c0_i32 : i32, i32
  }
  func.func @transform_1(%arg0: i32, %arg1: i32) -> (i32, i32) {
    %c0_i32 = arith.constant 0 : i32
    %c0_i32_0 = arith.constant 0 : i32
    return %c0_i32, %arg1 : i32, i32
  }
  func.func @transform_2(%arg0: i32, %arg1: i32) -> (i32, i32) {
    %c0_i32 = arith.constant 0 : i32
    %c0_i32_0 = arith.constant 0 : i32
    return %c0_i32, %arg1 : i32, i32
  }
  func.func @transform_3(%arg0: i32, %arg1: i32) -> (i32, i32) {
    %c0_i32 = arith.constant 0 : i32
    return %arg0, %arg1 : i32, i32
  }
}

</mosaic_0001>

<bundles_post_ra>
// kernel: forward.1
= control target key start
LH: loop header
LB: loop body
LE: loop exit
PB: predicated region body
PF: predicated region fallthrough
CT: control target
= control target key end

     0   :  { %8 = vsyncpa [#allocation3], 0  ;;  %s759_s12 = smov [#allocation2]   ;;  %s839_s0 = inlined_call_operand.vmem [shape: f32[16,768], index: 0, kind: input, shape index: {}]   ;;  %s840_s1 = inlined_call_operand.hbm [shape: bf16[768,8], index: 1, kind: input, shape index: {}]   ;;  %s841_s2 = inlined_call_operand.vmem [shape: f32[1,8], index: 2, kind: input, shape index: {}]   ;;  %s842_s3 = inlined_call_operand.vmem [shape: f32[16,8], index: 3, kind: output, shape index: {}]  }
   0x1   :  { %s16_s13 = sshll.u32 %s759_s12, 4  ;;  %s735_s16 = scalar_lea.hbm %s840_s1, 6144  ;;  %s17_s13 = int_to_ptr.vmem [resolvable:$true] %s16_s13 }
   0x2   :  { %p736_p0 = scmp.ne.s32.totalorder %s840_s1, %s735_s16  ;;  %p739_p1 = scmp.lt.u32.totalorder %s735_s16, %s840_s1 }
   0x4   :  { %p741_p2 = pnand %p739_p1, %p736_p0 }
   0x6   :  { %744 = shalt.err (!%p741_p2)
}
   0x7   :  { %s745_s21 = scalar_lea.vmem %s17_s13, 6144  ;;  %p750_p4 = scmp.lt.s32.totalorder %s17_s13, %s17_s13 }
   0x8   :  { %p746_p3 = scmp.ne.s32.totalorder %s17_s13, %s745_s21  ;;  %p751_p5 = scmp.lt.s32.totalorder %s745_s21, %s745_s21 }
   0xa   :  { %p752_p6 = por %p751_p5, %p750_p4 }
   0xc   :  { %p753_p7 = pnand %p752_p6, %p746_p3 }
   0xe   :  { %756 = shalt.err (!%p753_p7)
}
   0xf   :  { %s760_s22 = smov 64   ;;  %s761_s23 = smov 4  }
  0x10   :  { %22 = dma.hbm_to_vmem [thread:$0]  %s840_s1, 6144, %s17_s13, [#allocation3], %s760_s22, %s760_s22, %s761_s23  }
  0x11   :  { %757 = dma.done.wait [#allocation3], 6144  }
  0x12   :  { %758 = vsyncadd [#allocation3], 4294961152  ;;  %v687_v0 = vld [vmem:[#allocation2 + $0x40] sm:$0xff]   ;;  %v691_v4 = vld [vmem:[#allocation2 + $0x48] sm:$0xff]   ;;  %vm561_vm0 = vcmask 64512  }
  0x13   :  { %v688_v1 = vld [vmem:[#allocation2] sm:$0xff]   ;;  %618 = vmatprep.subr.bf16.mxu0 %v687_v0  ;;  %v692_v5 = vld [vmem:[#allocation2 + $0x8] sm:$0xff]   ;;  %v695_v8 = vld [vmem:[#allocation2 + $0x50] sm:$0xff]  }
  0x14   :  { %v689_v2 = vld [vmem:[#allocation2 + $0xc0] sm:$0xff]   ;;  %619 = vmatpush3.bf16.msra.mxu0 %v688_v1  ;;  %v693_v6 = vld [vmem:[#allocation2 + $0xc8] sm:$0xff]   ;;  %v696_v9 = vld [vmem:[#allocation2 + $0x10] sm:$0xff]  }
  0x15   :  { %v690_v3 = vld [vmem:[#allocation2 + $0x80] sm:$0xff]   ;;  %640 = vmatprep.subr.bf16.mxu1 %v689_v2  ;;  %620 = vmatprep.subr.bf16.mxu0 %v691_v4  ;;  %v694_v7 = vld [vmem:[#allocation2 + $0x88] sm:$0xff]   ;;  %v697_v10 = vld [vmem:[#allocation2 + $0xd0] sm:$0xff]  }
  0x16   :  { %641 = vmatpush3.bf16.msra.mxu1 %v690_v3  ;;  %v698_v11 = vld [vmem:[#allocation2 + $0x90] sm:$0xff]   ;;  %v699_v12 = vld [vmem:[#allocation2 + $0x58] sm:$0xff]   ;;  %v703_v16 = vld [vmem:[#allocation2 + $0x60] sm:$0xff]  }
  0x17   :  { %642 = vmatprep.subr.bf16.mxu1 %v693_v6  ;;  %v700_v13 = vld [vmem:[#allocation2 + $0x18] sm:$0xff]   ;;  %v704_v17 = vld [vmem:[#allocation2 + $0x20] sm:$0xff]   ;;  %v707_v20 = vld [vmem:[#allocation2 + $0x68] sm:$0xff]  }
  0x18   :  { %621 = vmatpush3.bf16.msra.mxu0 %v692_v5  ;;  %v701_v14 = vld [vmem:[#allocation2 + $0xd8] sm:$0xff]   ;;  %v705_v18 = vld [vmem:[#allocation2 + $0xe0] sm:$0xff]   ;;  %v708_v21 = vld [vmem:[#allocation2 + $0x28] sm:$0xff]  }
  0x19   :  { %622 = vmatprep.subr.bf16.mxu0 %v695_v8  ;;  %v702_v15 = vld [vmem:[#allocation2 + $0x98] sm:$0xff]   ;;  %v706_v19 = vld [vmem:[#allocation2 + $0xa0] sm:$0xff]   ;;  %v709_v22 = vld [vmem:[#allocation2 + $0xe8] sm:$0xff]  }
  0x1a   :  { %643 = vmatpush3.bf16.msra.mxu1 %v694_v7  ;;  %v710_v23 = vld [vmem:[#allocation2 + $0xa8] sm:$0xff]   ;;  %v711_v24 = vld [vmem:[#allocation2 + $0x70] sm:$0xff]   ;;  %v715_v28 = vld [vmem:[#allocation2 + $0x78] sm:$0xff]  }
  0x1b   :  { %644 = vmatprep.subr.bf16.mxu1 %v697_v10  ;;  %v712_v25 = vld [vmem:[#allocation2 + $0x30] sm:$0xff]   ;;  %v716_v29 = vld [vmem:[#allocation2 + $0x38] sm:$0xff]   ;;  %v30_v31 = vld [vmem:[%s839_s0 + $0x8] sm:$0xff] }
  0x1c   :  { %623 = vmatpush3.bf16.msra.mxu0 %v696_v9  ;;  %v713_v26 = vld [vmem:[#allocation2 + $0xf0] sm:$0xff]   ;;  %v717_v30 = vld [vmem:[#allocation2 + $0xf8] sm:$0xff]   ;;  %v29_v35 = vld [vmem:[%s839_s0] sm:$0xff] }
  0x1d   :  { %624 = vmatprep.subr.bf16.mxu0 %v699_v12  ;;  %v714_v27 = vld [vmem:[#allocation2 + $0xb0] sm:$0xff]   ;;  %v36_v32 = vld [vmem:[%s839_s0 + $0x38] sm:$0xff]  ;;  %v719_v38 = vld [vmem:[#allocation2 + $0x140] sm:$0xff]  }
  0x1e   :  { %645 = vmatpush3.bf16.msra.mxu1 %v698_v11  ;;  %v42_v33 = vpack.c.bf16 %v36_v32, %v30_v31  ;;  %v718_v34 = vld [vmem:[#allocation2 + $0xb8] sm:$0xff]   ;;  %v35_v36 = vld [vmem:[%s839_s0 + $0x30] sm:$0xff]  ;;  %v38_v40 = vld [vmem:[%s839_s0 + $0x48] sm:$0xff] }
  0x1f   :  { %646 = vmatprep.subr.bf16.mxu1 %v701_v14  ;;  %v41_v37 = vpack.c.bf16 %v35_v36, %v29_v35  ;;  %v32_v39 = vld [vmem:[%s839_s0 + $0x18] sm:$0xff]  ;;  %v720_v42 = vld [vmem:[#allocation2 + $0x100] sm:$0xff]   ;;  %v31_v43 = vld [vmem:[%s839_s0 + $0x10] sm:$0xff] }
  0x20   :  { %625 = vmatpush3.bf16.msra.mxu0 %v700_v13  ;;  %470 = vmatprep.mubr.bf16.mxu0 %v42_v33  ;;  %v44_v41 = vpack.c.bf16 %v38_v40, %v32_v39  ;;  %v37_v44 = vld [vmem:[%s839_s0 + $0x40] sm:$0xff]  ;;  %v721_v46 = vld [vmem:[#allocation2 + $0x148] sm:$0xff]   ;;  %v723_v48 = vld [vmem:[#allocation2 + $0x150] sm:$0xff]  }
  0x21   :  { %626 = vmatprep.subr.bf16.mxu0 %v703_v16  ;;  %v43_v45 = vpack.c.bf16 %v37_v44, %v31_v43  ;;  %v722_v47 = vld [vmem:[#allocation2 + $0x108] sm:$0xff]   ;;  %v724_v49 = vld [vmem:[#allocation2 + $0x110] sm:$0xff]   ;;  %v725_v50 = vld [vmem:[#allocation2 + $0x158] sm:$0xff]  }
  0x22   :  { %647 = vmatpush3.bf16.msra.mxu1 %v702_v15  ;;  %511 = vmatprep.mubr.bf16.mxu1 %v44_v41  ;;  %v726_v51 = vld [vmem:[#allocation2 + $0x118] sm:$0xff]   ;;  %v727_v52 = vld [vmem:[#allocation2 + $0x160] sm:$0xff]   ;;  %v729_v54 = vld [vmem:[#allocation2 + $0x168] sm:$0xff]  }
  0x23   :  { %648 = vmatprep.subr.bf16.mxu1 %v705_v18  ;;  %v728_v53 = vld [vmem:[#allocation2 + $0x120] sm:$0xff]   ;;  %v34_v55 = vld [vmem:[%s839_s0 + $0x28] sm:$0xff]  ;;  %v40_v56 = vld [vmem:[%s839_s0 + $0x58] sm:$0xff] }
  0x24   :  { %627 = vmatpush3.bf16.msra.mxu0 %v704_v17  ;;  %v46_v57 = vpack.c.bf16 %v40_v56, %v34_v55  ;;  %v730_v58 = vld [vmem:[#allocation2 + $0x128] sm:$0xff]   ;;  %v731_v59 = vld [vmem:[#allocation2 + $0x170] sm:$0xff]   ;;  %v733_v61 = vld [vmem:[#allocation2 + $0x178] sm:$0xff]  }
  0x25   :  { %628 = vmatprep.subr.bf16.mxu0 %v707_v20  ;;  %v732_v60 = vld [vmem:[#allocation2 + $0x130] sm:$0xff]   ;;  %v734_v62 = vld [vmem:[#allocation2 + $0x138] sm:$0xff]   ;;  %v33_v63 = vld [vmem:[%s839_s0 + $0x20] sm:$0xff] }
  0x26   :  { %649 = vmatpush3.bf16.msra.mxu1 %v706_v19  ;;  %v39_v0 = vld [vmem:[%s839_s0 + $0x50] sm:$0xff]  ;;  %v569_v3 = vld [vmem:[%s841_s2] ss:$0 sm:$0xff] }
  0x27   :  { %650 = vmatprep.subr.bf16.mxu1 %v709_v22  ;;  %v45_v1 = vpack.c.bf16 %v39_v0, %v33_v63 }
  0x28   :  { %629 = vmatpush3.bf16.msra.mxu0 %v708_v21 }
  0x29   :  { %630 = vmatprep.subr.bf16.mxu0 %v711_v24 }
  0x2a   :  { %651 = vmatpush3.bf16.msra.mxu1 %v710_v23 }
  0x2b   :  { %652 = vmatprep.subr.bf16.mxu1 %v713_v26 }
  0x2c   :  { %631 = vmatpush3.bf16.msra.mxu0 %v712_v25 }
  0x2d   :  { %632 = vmatprep.subr.bf16.mxu0 %v715_v28 }
  0x2e   :  { %653 = vmatpush3.bf16.msra.mxu1 %v714_v27 }
  0x2f   :  { %654 = vmatprep.subr.bf16.mxu1 %v717_v30 }
  0x30   :  { %633 = vmatpush3.bf16.msra.mxu0 %v716_v29 }
  0x31   :  { %662 = vmatprep.subr.bf16.mxu0 %v719_v38 }
  0x32   :  { %655 = vmatpush3.bf16.msra.mxu1 %v718_v34 }
  0x33   :  { %471 = vmatmul.mubr.bf16.vlgmr.msra.gmra.mrb[0].mxu0 %v41_v37 }
  0x34   :  { %663 = vmatpush3.bf16.msra.mxu0 %v720_v42  ;;  %552 = vmatprep.mubr.bf16.mxu0 %v46_v57 }
  0x35   :  { %512 = vmatmul.mubr.bf16.vlgmr.msra.gmra.mrb[0].mxu1 %v43_v45  ;;  %664 = vmatprep.subr.bf16.mxu0 %v721_v46 }
  0x38   :  { %665 = vmatpush3.bf16.msra.mxu0 %v722_v47 }
  0x39   :  { %666 = vmatprep.subr.bf16.mxu0 %v723_v48 }
  0x3c   :  { %667 = vmatpush3.bf16.msra.mxu0 %v724_v49 }
  0x3d   :  { %668 = vmatprep.subr.bf16.mxu0 %v725_v50 }
  0x40   :  { %669 = vmatpush3.bf16.msra.mxu0 %v726_v51 }
  0x41   :  { %670 = vmatprep.subr.bf16.mxu0 %v727_v52 }
  0x44   :  { %671 = vmatpush3.bf16.msra.mxu0 %v728_v53 }
  0x45   :  { %672 = vmatprep.subr.bf16.mxu0 %v729_v54 }
  0x48   :  { %673 = vmatpush3.bf16.msra.mxu0 %v730_v58 }
  0x49   :  { %674 = vmatprep.subr.bf16.mxu0 %v731_v59 }
  0x4c   :  { %675 = vmatpush3.bf16.msra.mxu0 %v732_v60 }
  0x4d   :  { %676 = vmatprep.subr.bf16.mxu0 %v733_v61 }
  0x50   :  { %677 = vmatpush3.bf16.msra.mxu0 %v734_v62 }
  0x53   :  { %553 = vmatmul.mubr.bf16.vlgmr.msra.gmra.mrb[4].mxu0 %v45_v1 }
 0x106   :  { %v634_v2 = vpop.f32.mrb[0].mxu0 }
 0x107   :  { %v635_v4 = vpop.f32.mrb[1].mxu0 }
 0x108   :  { %v636_v5 = vadd.f32 %v635_v4, %v634_v2  ;;  %v637_v6 = vpop.f32.mrb[2].mxu0  ;;  %v656_v7 = vpop.f32.mrb[0].mxu1 }
 0x109   :  { %v638_v8 = vpop.f32.mrb[3].mxu0  ;;  %v657_v11 = vpop.f32.mrb[1].mxu1 }
 0x10a   :  { %v473_v9 = vadd.f32 %v636_v5, %v569_v3  ;;  %v639_v10 = vadd.f32 %v638_v8, %v637_v6  ;;  %v658_v12 = vadd.f32 %v657_v11, %v656_v7  ;;  %v659_v13 = vpop.f32.mrb[2].mxu1 }
 0x10b   :  { %v660_v15 = vpop.f32.mrb[3].mxu1 }
 0x10c   :  { %v476_v14 = vadd.f32 %v639_v10, %v569_v3  ;;  %v514_v16 = vadd.f32 %v658_v12, %v473_v9  ;;  %v661_v17 = vadd.f32 %v660_v15, %v659_v13 }
 0x10e   :  { %v517_v18 = vadd.f32 %v661_v17, %v476_v14 }
 0x126   :  { %v678_v19 = vpop.f32.mrb[4].mxu0 }
 0x127   :  { %v679_v20 = vpop.f32.mrb[5].mxu0 }
 0x128   :  { %v680_v21 = vadd.f32 %v679_v20, %v678_v19  ;;  %v681_v22 = vpop.f32.mrb[6].mxu0 }
 0x129   :  { %v682_v23 = vpop.f32.mrb[7].mxu0 }
 0x12a   :  { %v555_v24 = vadd.f32 %v680_v21, %v514_v16  ;;  %v683_v25 = vadd.f32 %v682_v23, %v681_v22 }
 0x12c   :  { %562 = vst.msk [vmem:[%s842_s3] sm:$0xff] %vm561_vm0, %v555_v24  ;;  %v558_v26 = vadd.f32 %v683_v25, %v517_v18 }
 0x12e   :  { %563 = vst.msk [vmem:[%s842_s3 + $0x8] sm:$0xff] %vm561_vm0, %v558_v26 }
 0x12f   :  { %568 = vsyncpa [#allocation3], 1 }

</bundles_post_ra>
